<compile_context>
chip_gen: v6e
topology: v6e:2x2x1
jax: 0.10.0
libtpu: 0.0.40
codegen_flags: <defaults>
</compile_context>

<pallas_src>
from functools import partial

import jax
import jax.numpy as jnp
from jax import lax
from jax.experimental import pallas as pl
from jax.experimental.pallas import tpu as pltpu

BN_EPS = 1e-5
MATMUL_DTYPE = jnp.bfloat16     # MXU operand dtype (accumulation stays f32)
DEFAULT_TILE_N = 512            # batch tile (multiple of 128); clamped to small N
LANE_PAD = 128                  # feature-dim padding target (use 256 on v6e/v7x prod)


def _round_up(v, m):
    return (v + m - 1) // m * m


# ---------------------------------------------------------------------------
# Fused kernel: entire network forward for one batch tile
# ---------------------------------------------------------------------------
def _ffn_fused_kernel(x_ref, *refs):
    """refs = (w_0, b_0, ..., w_{L-1}, b_{L-1}, w_head_row, b_head, o_ref).

    Hidden block i: h = ReLU(h @ w_i + b_i)   (BN already folded into w/b).
    Head:           o_row = sigmoid(w_head_row @ h^T + b_head)   -> (1, tile_n).
    """
    o_ref = refs[-1]
    params = refs[:-1]
    n_hidden = (len(params) - 2) // 2

    # Activations travel between layers as bf16; elementwise bias+ReLU in f32.
    h = x_ref[...].astype(MATMUL_DTYPE)                  # (tile_n, d_in)
    for i in range(n_hidden):                            # static unroll
        w_ref = params[2 * i]                            # (prev_pad, hid_pad) bf16
        b_ref = params[2 * i + 1]                        # (1, hid_pad) f32
        y = jnp.dot(h, w_ref[...], preferred_element_type=jnp.float32)  # MXU, f32 acc
        h = jnp.maximum(y + b_ref[...], 0.0).astype(MATMUL_DTYPE)

    wh_ref, bh_ref = params[-2], params[-1]              # (1, prev_pad) bf16, (1, 1) f32
    # Contract the feature dim of both operands: (1, P) x (tile_n, P) -> (1, tile_n).
    # This keeps the output lane-dense (one full row per grid step).
    logits = lax.dot_general(
        wh_ref[...], h,
        dimension_numbers=(((1,), (1,)), ((), ())),
        preferred_element_type=jnp.float32) + bh_ref[...]
    o_ref[...] = jax.nn.sigmoid(logits).astype(o_ref.dtype)


# ---------------------------------------------------------------------------
# Wrapper: single pallas_call, batch-tiled grid, weights VMEM-resident
# ---------------------------------------------------------------------------
@partial(jax.jit, static_argnames=("weight_buffers",))
def ffn_classifier_forward(x, fused_hidden, fused_head, weight_buffers=1):
    n, d_in = x.shape
    n_pad = _round_up(n, 8)                 # sublane alignment only (<= 7 extra rows)
    if n_pad != n:
        x = jnp.pad(x, ((0, n_pad - n), (0, 0)))
    tile_n = min(DEFAULT_TILE_N, n_pad)
    n_tiles = (n_pad + tile_n - 1) // tile_n   # ragged last tile handled by edge masking

    flat_params = []
    for w, b in fused_hidden:
        flat_params += [w, b]
    flat_params += [fused_head[0], fused_head[1]]

    # Explicit scoped-VMEM budget: resident weights (x buffer count) + double-
    # buffered input/output tiles + activation working set, with 2x headroom.
    # Capped at 64 MiB so the same budget is valid per-TensorCore on v7x
    # (raise toward ~100 MiB on v5e/v6e if a production weight set needs it).
    param_bytes = sum(int(p.size) * p.dtype.itemsize for p in flat_params)
    wb = weight_buffers if weight_buffers is not None else 2
    max_width = max([d_in] + [int(w.shape[1]) for w, _ in fused_hidden])
    act_bytes = 6 * tile_n * max_width * 4
    io_bytes = 2 * tile_n * d_in * 4 + 2 * tile_n * 4
    vmem_limit = int(min(max(2 * (param_bytes * wb + act_bytes + io_bytes),
                             32 << 20), 64 << 20))

    def _resident_spec(p):
        assert p.ndim == 2, "resident params must be 2-D"
        if weight_buffers is None:
            return pl.BlockSpec(p.shape, lambda i: (0, 0))
        # Constant block index: fetched once, reused every batch tile. Buffered(1)
        # disables pointless double-buffering of these never-refetched operands.
        return pl.BlockSpec(p.shape, lambda i: (0, 0),
                            pipeline_mode=pl.Buffered(weight_buffers))

    out = pl.pallas_call(
        _ffn_fused_kernel,
        out_shape=jax.ShapeDtypeStruct((n_tiles, tile_n), jnp.float32),
        grid=(n_tiles,),
        in_specs=[pl.BlockSpec((tile_n, d_in), lambda i: (i, 0))]
                 + [_resident_spec(p) for p in flat_params],
        out_specs=pl.BlockSpec((1, tile_n), lambda i: (i, 0)),   # lane-dense row store
        compiler_params=pltpu.CompilerParams(
            dimension_semantics=("parallel",),
            vmem_limit_bytes=vmem_limit),
    )(x, *flat_params)

    return out.reshape(-1, 1)[:n]           # back to (n, 1) probabilities


# ---------------------------------------------------------------------------
# Parameter construction (deterministic, synthetic) — mirrors PyTorch layout
# ---------------------------------------------------------------------------
def init_params(key, input_dim, architecture):
    params = []
    prev = input_dim
    for hdim in architecture:
        key, k_w, k_b, k_g, k_be, k_m, k_v = jax.random.split(key, 7)
        bound = 1.0 / jnp.sqrt(prev)
        params.append(dict(
            w=jax.random.uniform(k_w, (prev, hdim), jnp.float32, -bound, bound),
            b=jax.random.uniform(k_b, (1, hdim), jnp.float32, -bound, bound),
            gamma=1.0 + 0.1 * jax.random.normal(k_g, (1, hdim), jnp.float32),
            beta=0.1 * jax.random.normal(k_be, (1, hdim), jnp.float32),
            running_mean=0.1 * jax.random.normal(k_m, (1, hdim), jnp.float32),
            running_var=1.0 + 0.1 * jax.random.uniform(k_v, (1, hdim), jnp.float32),
        ))
        prev = hdim
    key, k_w, k_b = jax.random.split(key, 3)
    bound = 1.0 / jnp.sqrt(prev)
    head_params = dict(
        w=jax.random.uniform(k_w, (prev, 1), jnp.float32, -bound, bound),
        b=jax.random.uniform(k_b, (1, 1), jnp.float32, -bound, bound),
    )
    return params, head_params


def fold_params(hidden_params, head_params):
    """Fold eval-mode BatchNorm into the FOLLOWING Linear (f32), then zero-pad
    hidden feature dims to multiples of LANE_PAD and cast weights to bf16.

    Block i output after ReLU is h_i; BN_i gives z_i = h_i*s_i + t_i; the next
    Linear sees z_i @ W + b = h_i @ (s_i^T * W) + (t_i @ W + b).  Zero-padding
    extra feature columns/rows is numerically exact (padded activations are 0).
    """
    # --- 1) BN folding in f32 on original dims -----------------------------
    folded_hidden = []
    scale = None
    shift = None
    for p in hidden_params:
        w, b = p["w"], p["b"]
        if scale is not None:
            b = b + shift @ w                 # uses the original (unscaled) W
            w = scale.reshape(-1, 1) * w      # row-scale W by previous BN scale
        folded_hidden.append((w, b))
        s = p["gamma"] * jax.lax.rsqrt(p["running_var"] + BN_EPS)
        t = p["beta"] - p["running_mean"] * s
        scale, shift = s, t
    wh, bh = head_params["w"], head_params["b"]          # (prev, 1), (1, 1)
    if scale is not None:
        bh = bh + shift @ wh
        wh = scale.reshape(-1, 1) * wh

    # --- 2) lane padding + bf16 cast ---------------------------------------
    fused_hidden = []
    prev_pad = folded_hidden[0][0].shape[0] if folded_hidden else wh.shape[0]
    for w, b in folded_hidden:
        prev, hid = w.shape
        hid_pad = _round_up(hid, LANE_PAD)
        w_p = jnp.zeros((prev_pad, hid_pad), jnp.float32).at[:prev, :hid].set(w)
        b_p = jnp.zeros((1, hid_pad), jnp.float32).at[:, :hid].set(b)
        fused_hidden.append((w_p.astype(MATMUL_DTYPE), b_p))
        prev_pad = hid_pad

    wh_row = wh.reshape(1, -1)                           # (1, prev)
    prev = wh_row.shape[1]
    wh_p = jnp.zeros((1, prev_pad), jnp.float32).at[:, :prev].set(wh_row)
    fused_head = (wh_p.astype(MATMUL_DTYPE), bh.astype(jnp.float32))
    return fused_hidden, fused_head


# ---------------------------------------------------------------------------
# Pure-JAX reference (original un-folded params, f32 — PyTorch eval semantics)
# ---------------------------------------------------------------------------
def reference_forward(x, hidden_params, head_params):
    h = x
    for p in hidden_params:
        h = jnp.maximum(h @ p["w"] + p["b"], 0.0)
        h = (h - p["running_mean"]) * jax.lax.rsqrt(p["running_var"] + BN_EPS) \
            * p["gamma"] + p["beta"]
    return jax.nn.sigmoid(h @ head_params["w"] + head_params["b"])


if __name__ == "__main__":
    key = jax.random.PRNGKey(0)
    key, k_x, k_p = jax.random.split(key, 3)

    batch = 8
    input_dim = 32
    architecture = (64, 32)

    x = jax.random.normal(k_x, (batch, input_dim), jnp.float32)
    hidden_params, head_params = init_params(k_p, input_dim, architecture)
    fused_hidden, fused_head = fold_params(hidden_params, head_params)

    try:
        out = ffn_classifier_forward(x, fused_hidden, fused_head, weight_buffers=1)
        out = jax.block_until_ready(out)
    except Exception:
        # Conservative fallback: default (double-buffered) resident weights.
        out = ffn_classifier_forward(x, fused_hidden, fused_head, weight_buffers=None)
        out = jax.block_until_ready(out)

    ref = reference_forward(x, hidden_params, head_params)
    assert out.shape == (batch, 1)
    # bf16 matmul operands perturb results slightly vs the f32 reference.
    assert jnp.allclose(out, ref, atol=3e-2, rtol=3e-2), "mismatch vs reference"

    print("KERNEL_OK")
</pallas_src>

<mosaic_0001>
module attributes {stable_mosaic.version = 11 : i64} {
  func.func @_ffn_fused_kernel(%arg0: i32, %arg1: memref<8x32xf32, #tpu.memory_space<vmem>>, %arg2: memref<32x128xbf16, #tpu.memory_space<vmem>>, %arg3: memref<1x128xf32, #tpu.memory_space<vmem>>, %arg4: memref<128x128xbf16, #tpu.memory_space<vmem>>, %arg5: memref<1x128xf32, #tpu.memory_space<vmem>>, %arg6: memref<1x128xbf16, #tpu.memory_space<vmem>>, %arg7: memref<1x1xf32, #tpu.memory_space<vmem>>, %arg8: memref<1x8xf32, #tpu.memory_space<vmem>>) attributes {dimension_semantics = [#tpu.dimension_semantics<parallel>], iteration_bounds = array<i64: 1>, scalar_prefetch = 0 : i64, scratch_operands = 0 : i64, tpu.core_type = #tpu.core_type<tc>, window_params = [{transform_indices = @transform_0, window_bounds = array<i64: 8, 32>}, {pipeline_mode = #tpu.pipeline_mode<synchronous>, transform_indices = @transform_1, window_bounds = array<i64: 32, 128>}, {pipeline_mode = #tpu.pipeline_mode<synchronous>, transform_indices = @transform_2, window_bounds = array<i64: 1, 128>}, {pipeline_mode = #tpu.pipeline_mode<synchronous>, transform_indices = @transform_3, window_bounds = array<i64: 128, 128>}, {pipeline_mode = #tpu.pipeline_mode<synchronous>, transform_indices = @transform_4, window_bounds = array<i64: 1, 128>}, {pipeline_mode = #tpu.pipeline_mode<synchronous>, transform_indices = @transform_5, window_bounds = array<i64: 1, 128>}, {pipeline_mode = #tpu.pipeline_mode<synchronous>, transform_indices = @transform_6, window_bounds = array<i64: 1, 1>}, {transform_indices = @transform_7, window_bounds = array<i64: 1, 8>}]} {
    %c0 = arith.constant 0 : index
    %c0_0 = arith.constant 0 : index
    %0 = vector.load %arg1[%c0, %c0_0] : memref<8x32xf32, #tpu.memory_space<vmem>>, vector<8x32xf32>
    %1 = arith.truncf %0 : vector<8x32xf32> to vector<8x32xbf16>
    %c0_1 = arith.constant 0 : index
    %c0_2 = arith.constant 0 : index
    %2 = vector.load %arg2[%c0_1, %c0_2] : memref<32x128xbf16, #tpu.memory_space<vmem>>, vector<32x128xbf16>
    %cst = arith.constant dense<0.000000e+00> : vector<8x128xf32>
    %3 = tpu.matmul %1, %2, %cst {dimension_numbers = #tpu.dot_dimension_numbers<[1], [0], [0], [1], [0, 0, 1, 1], [], []>} : vector<8x32xbf16>, vector<32x128xbf16>, vector<8x128xf32> -> vector<8x128xf32>
    %c0_3 = arith.constant 0 : index
    %c0_4 = arith.constant 0 : index
    %4 = vector.load %arg3[%c0_3, %c0_4] : memref<1x128xf32, #tpu.memory_space<vmem>>, vector<1x128xf32>
    %5 = vector.broadcast %4 : vector<1x128xf32> to vector<8x128xf32>
    %6 = arith.addf %3, %5 : vector<8x128xf32>
    %cst_5 = arith.constant 0.000000e+00 : f32
    %7 = vector.broadcast %cst_5 : f32 to vector<8x128xf32>
    %8 = arith.maximumf %6, %7 : vector<8x128xf32>
    %9 = arith.truncf %8 : vector<8x128xf32> to vector<8x128xbf16>
    %c0_6 = arith.constant 0 : index
    %c0_7 = arith.constant 0 : index
    %10 = vector.load %arg4[%c0_6, %c0_7] : memref<128x128xbf16, #tpu.memory_space<vmem>>, vector<128x128xbf16>
    %cst_8 = arith.constant dense<0.000000e+00> : vector<8x128xf32>
    %11 = tpu.matmul %9, %10, %cst_8 {dimension_numbers = #tpu.dot_dimension_numbers<[1], [0], [0], [1], [0, 0, 1, 1], [], []>} : vector<8x128xbf16>, vector<128x128xbf16>, vector<8x128xf32> -> vector<8x128xf32>
    %c0_9 = arith.constant 0 : index
    %c0_10 = arith.constant 0 : index
    %12 = vector.load %arg5[%c0_9, %c0_10] : memref<1x128xf32, #tpu.memory_space<vmem>>, vector<1x128xf32>
    %13 = vector.broadcast %12 : vector<1x128xf32> to vector<8x128xf32>
    %14 = arith.addf %11, %13 : vector<8x128xf32>
    %cst_11 = arith.constant 0.000000e+00 : f32
    %15 = vector.broadcast %cst_11 : f32 to vector<8x128xf32>
    %16 = arith.maximumf %14, %15 : vector<8x128xf32>
    %17 = arith.truncf %16 : vector<8x128xf32> to vector<8x128xbf16>
    %c0_12 = arith.constant 0 : index
    %c0_13 = arith.constant 0 : index
    %18 = vector.load %arg6[%c0_12, %c0_13] : memref<1x128xbf16, #tpu.memory_space<vmem>>, vector<1x128xbf16>
    %cst_14 = arith.constant dense<0.000000e+00> : vector<1x8xf32>
    %19 = tpu.matmul %18, %17, %cst_14 {dimension_numbers = #tpu.dot_dimension_numbers<[1], [1], [0], [0], [0, 0, 1, 0], [], []>} : vector<1x128xbf16>, vector<8x128xbf16>, vector<1x8xf32> -> vector<1x8xf32>
    %c0_15 = arith.constant 0 : index
    %c0_16 = arith.constant 0 : index
    %20 = vector.load %arg7[%c0_15, %c0_16] : memref<1x1xf32, #tpu.memory_space<vmem>>, vector<1x1xf32>
    %21 = vector.broadcast %20 : vector<1x1xf32> to vector<1x8xf32>
    %22 = arith.addf %19, %21 : vector<1x8xf32>
    %23 = arith.negf %22 : vector<1x8xf32>
    %24 = math.exp %23 : vector<1x8xf32>
    %cst_17 = arith.constant 1.000000e+00 : f32
    %25 = vector.broadcast %cst_17 : f32 to vector<1x8xf32>
    %26 = arith.addf %25, %24 : vector<1x8xf32>
    %27 = arith.divf %25, %26 : vector<1x8xf32>
    %c0_18 = arith.constant 0 : index
    %c0_19 = arith.constant 0 : index
    %28 = vector.load %arg8[%c0_18, %c0_19] : memref<1x8xf32, #tpu.memory_space<vmem>>, vector<1x8xf32>
    tpu.vector_store %arg8[%c0_18, %c0_19], %27 {strides = array<i32>} : memref<1x8xf32, #tpu.memory_space<vmem>>, vector<1x8xf32>,
    return
  }
  func.func @transform_0(%arg0: i32) -> (i32, i32) {
    %c0_i32 = arith.constant 0 : i32
    %c0_i32_0 = arith.constant 0 : i32
    return %arg0, %c0_i32 : i32, i32
  }
  func.func @transform_1(%arg0: i32) -> (i32, i32) {
    %c0_i32 = arith.constant 0 : i32
    %c0_i32_0 = arith.constant 0 : i32
    %c0_i32_1 = arith.constant 0 : i32
    return %c0_i32, %c0_i32_0 : i32, i32
  }
  func.func @transform_2(%arg0: i32) -> (i32, i32) {
    %c0_i32 = arith.constant 0 : i32
    %c0_i32_0 = arith.constant 0 : i32
    %c0_i32_1 = arith.constant 0 : i32
    return %c0_i32, %c0_i32_0 : i32, i32
  }
  func.func @transform_3(%arg0: i32) -> (i32, i32) {
    %c0_i32 = arith.constant 0 : i32
    %c0_i32_0 = arith.constant 0 : i32
    %c0_i32_1 = arith.constant 0 : i32
    return %c0_i32, %c0_i32_0 : i32, i32
  }
  func.func @transform_4(%arg0: i32) -> (i32, i32) {
    %c0_i32 = arith.constant 0 : i32
    %c0_i32_0 = arith.constant 0 : i32
    %c0_i32_1 = arith.constant 0 : i32
    return %c0_i32, %c0_i32_0 : i32, i32
  }
  func.func @transform_5(%arg0: i32) -> (i32, i32) {
    %c0_i32 = arith.constant 0 : i32
    %c0_i32_0 = arith.constant 0 : i32
    %c0_i32_1 = arith.constant 0 : i32
    return %c0_i32, %c0_i32_0 : i32, i32
  }
  func.func @transform_6(%arg0: i32) -> (i32, i32) {
    %c0_i32 = arith.constant 0 : i32
    %c0_i32_0 = arith.constant 0 : i32
    %c0_i32_1 = arith.constant 0 : i32
    return %c0_i32, %c0_i32_0 : i32, i32
  }
  func.func @transform_7(%arg0: i32) -> (i32, i32) {
    %c0_i32 = arith.constant 0 : i32
    %c0_i32_0 = arith.constant 0 : i32
    return %arg0, %c0_i32 : i32, i32
  }
}

module attributes {stable_mosaic.version = 11 : i64} {
  func.func @_ffn_fused_kernel(%arg0: i32, %arg1: memref<8x32xf32, #tpu.memory_space<vmem>>, %arg2: memref<32x128xbf16, #tpu.memory_space<vmem>>, %arg3: memref<1x128xf32, #tpu.memory_space<vmem>>, %arg4: memref<128x128xbf16, #tpu.memory_space<vmem>>, %arg5: memref<1x128xf32, #tpu.memory_space<vmem>>, %arg6: memref<1x128xbf16, #tpu.memory_space<vmem>>, %arg7: memref<1x1xf32, #tpu.memory_space<vmem>>, %arg8: memref<1x8xf32, #tpu.memory_space<vmem>>) attributes {dimension_semantics = [#tpu.dimension_semantics<parallel>], iteration_bounds = array<i64: 1>, scalar_prefetch = 0 : i64, scratch_operands = 0 : i64, tpu.core_type = #tpu.core_type<tc>, window_params = [{transform_indices = @transform_0, window_bounds = array<i64: 8, 32>}, {pipeline_mode = #tpu.pipeline_mode<synchronous>, transform_indices = @transform_1, window_bounds = array<i64: 32, 128>}, {pipeline_mode = #tpu.pipeline_mode<synchronous>, transform_indices = @transform_2, window_bounds = array<i64: 1, 128>}, {pipeline_mode = #tpu.pipeline_mode<synchronous>, transform_indices = @transform_3, window_bounds = array<i64: 128, 128>}, {pipeline_mode = #tpu.pipeline_mode<synchronous>, transform_indices = @transform_4, window_bounds = array<i64: 1, 128>}, {pipeline_mode = #tpu.pipeline_mode<synchronous>, transform_indices = @transform_5, window_bounds = array<i64: 1, 128>}, {pipeline_mode = #tpu.pipeline_mode<synchronous>, transform_indices = @transform_6, window_bounds = array<i64: 1, 1>}, {transform_indices = @transform_7, window_bounds = array<i64: 1, 8>}]} {
    %c0 = arith.constant 0 : index
    %c0_0 = arith.constant 0 : index
    %0 = vector.load %arg1[%c0, %c0_0] : memref<8x32xf32, #tpu.memory_space<vmem>>, vector<8x32xf32>
    %1 = arith.truncf %0 : vector<8x32xf32> to vector<8x32xbf16>
    %c0_1 = arith.constant 0 : index
    %c0_2 = arith.constant 0 : index
    %2 = vector.load %arg2[%c0_1, %c0_2] : memref<32x128xbf16, #tpu.memory_space<vmem>>, vector<32x128xbf16>
    %cst = arith.constant dense<0.000000e+00> : vector<8x128xf32>
    %3 = tpu.matmul %1, %2, %cst {dimension_numbers = #tpu.dot_dimension_numbers<[1], [0], [0], [1], [0, 0, 1, 1], [], []>} : vector<8x32xbf16>, vector<32x128xbf16>, vector<8x128xf32> -> vector<8x128xf32>
    %c0_3 = arith.constant 0 : index
    %c0_4 = arith.constant 0 : index
    %4 = vector.load %arg3[%c0_3, %c0_4] : memref<1x128xf32, #tpu.memory_space<vmem>>, vector<1x128xf32>
    %5 = vector.broadcast %4 : vector<1x128xf32> to vector<8x128xf32>
    %6 = arith.addf %3, %5 : vector<8x128xf32>
    %cst_5 = arith.constant 0.000000e+00 : f32
    %7 = vector.broadcast %cst_5 : f32 to vector<8x128xf32>
    %8 = arith.maximumf %6, %7 : vector<8x128xf32>
    %9 = arith.truncf %8 : vector<8x128xf32> to vector<8x128xbf16>
    %c0_6 = arith.constant 0 : index
    %c0_7 = arith.constant 0 : index
    %10 = vector.load %arg4[%c0_6, %c0_7] : memref<128x128xbf16, #tpu.memory_space<vmem>>, vector<128x128xbf16>
    %cst_8 = arith.constant dense<0.000000e+00> : vector<8x128xf32>
    %11 = tpu.matmul %9, %10, %cst_8 {dimension_numbers = #tpu.dot_dimension_numbers<[1], [0], [0], [1], [0, 0, 1, 1], [], []>} : vector<8x128xbf16>, vector<128x128xbf16>, vector<8x128xf32> -> vector<8x128xf32>
    %c0_9 = arith.constant 0 : index
    %c0_10 = arith.constant 0 : index
    %12 = vector.load %arg5[%c0_9, %c0_10] : memref<1x128xf32, #tpu.memory_space<vmem>>, vector<1x128xf32>
    %13 = vector.broadcast %12 : vector<1x128xf32> to vector<8x128xf32>
    %14 = arith.addf %11, %13 : vector<8x128xf32>
    %cst_11 = arith.constant 0.000000e+00 : f32
    %15 = vector.broadcast %cst_11 : f32 to vector<8x128xf32>
    %16 = arith.maximumf %14, %15 : vector<8x128xf32>
    %17 = arith.truncf %16 : vector<8x128xf32> to vector<8x128xbf16>
    %c0_12 = arith.constant 0 : index
    %c0_13 = arith.constant 0 : index
    %18 = vector.load %arg6[%c0_12, %c0_13] : memref<1x128xbf16, #tpu.memory_space<vmem>>, vector<1x128xbf16>
    %cst_14 = arith.constant dense<0.000000e+00> : vector<1x8xf32>
    %19 = tpu.matmul %18, %17, %cst_14 {dimension_numbers = #tpu.dot_dimension_numbers<[1], [1], [0], [0], [0, 0, 1, 0], [], []>} : vector<1x128xbf16>, vector<8x128xbf16>, vector<1x8xf32> -> vector<1x8xf32>
    %c0_15 = arith.constant 0 : index
    %c0_16 = arith.constant 0 : index
    %20 = vector.load %arg7[%c0_15, %c0_16] : memref<1x1xf32, #tpu.memory_space<vmem>>, vector<1x1xf32>
    %21 = vector.broadcast %20 : vector<1x1xf32> to vector<1x8xf32>
    %22 = arith.addf %19, %21 : vector<1x8xf32>
    %23 = arith.negf %22 : vector<1x8xf32>
    %24 = math.exp %23 : vector<1x8xf32>
    %cst_17 = arith.constant 1.000000e+00 : f32
    %25 = vector.broadcast %cst_17 : f32 to vector<1x8xf32>
    %26 = arith.addf %25, %24 : vector<1x8xf32>
    %27 = arith.divf %25, %26 : vector<1x8xf32>
    %c0_18 = arith.constant 0 : index
    %c0_19 = arith.constant 0 : index
    %28 = vector.load %arg8[%c0_18, %c0_19] : memref<1x8xf32, #tpu.memory_space<vmem>>, vector<1x8xf32>
    tpu.vector_store %arg8[%c0_18, %c0_19], %27 {strides = array<i32>} : memref<1x8xf32, #tpu.memory_space<vmem>>, vector<1x8xf32>,
    return
  }
  func.func @transform_0(%arg0: i32) -> (i32, i32) {
    %c0_i32 = arith.constant 0 : i32
    %c0_i32_0 = arith.constant 0 : i32
    return %arg0, %c0_i32 : i32, i32
  }
  func.func @transform_1(%arg0: i32) -> (i32, i32) {
    %c0_i32 = arith.constant 0 : i32
    %c0_i32_0 = arith.constant 0 : i32
    %c0_i32_1 = arith.constant 0 : i32
    return %c0_i32, %c0_i32_0 : i32, i32
  }
  func.func @transform_2(%arg0: i32) -> (i32, i32) {
    %c0_i32 = arith.constant 0 : i32
    %c0_i32_0 = arith.constant 0 : i32
    %c0_i32_1 = arith.constant 0 : i32
    return %c0_i32, %c0_i32_0 : i32, i32
  }
  func.func @transform_3(%arg0: i32) -> (i32, i32) {
    %c0_i32 = arith.constant 0 : i32
    %c0_i32_0 = arith.constant 0 : i32
    %c0_i32_1 = arith.constant 0 : i32
    return %c0_i32, %c0_i32_0 : i32, i32
  }
  func.func @transform_4(%arg0: i32) -> (i32, i32) {
    %c0_i32 = arith.constant 0 : i32
    %c0_i32_0 = arith.constant 0 : i32
    %c0_i32_1 = arith.constant 0 : i32
    return %c0_i32, %c0_i32_0 : i32, i32
  }
  func.func @transform_5(%arg0: i32) -> (i32, i32) {
    %c0_i32 = arith.constant 0 : i32
    %c0_i32_0 = arith.constant 0 : i32
    %c0_i32_1 = arith.constant 0 : i32
    return %c0_i32, %c0_i32_0 : i32, i32
  }
  func.func @transform_6(%arg0: i32) -> (i32, i32) {
    %c0_i32 = arith.constant 0 : i32
    %c0_i32_0 = arith.constant 0 : i32
    %c0_i32_1 = arith.constant 0 : i32
    return %c0_i32, %c0_i32_0 : i32, i32
  }
  func.func @transform_7(%arg0: i32) -> (i32, i32) {
    %c0_i32 = arith.constant 0 : i32
    %c0_i32_0 = arith.constant 0 : i32
    return %arg0, %c0_i32 : i32, i32
  }
}

</mosaic_0001>

<bundles_post_ra>
// kernel: ffn_classifier_forward.1
= control target key start
LH: loop header
LB: loop body
LE: loop exit
PB: predicated region body
PF: predicated region fallthrough
CT: control target
= control target key end

     0   :  { %s576_s0 = inlined_call_operand.hbm [shape: f32[8,32], index: 0, kind: input, shape index: {}]   ;;  %s577_s1 = inlined_call_operand.hbm [shape: bf16[32,128], index: 1, kind: input, shape index: {}]   ;;  %s578_s2 = inlined_call_operand.vmem [shape: f32[1,128], index: 2, kind: input, shape index: {}]   ;;  %s579_s3 = inlined_call_operand.hbm [shape: bf16[128,128], index: 3, kind: input, shape index: {}]   ;;  %s580_s4 = inlined_call_operand.vmem [shape: f32[1,128], index: 4, kind: input, shape index: {}]   ;;  %s581_s5 = inlined_call_operand.vmem [shape: bf16[1,128], index: 5, kind: input, shape index: {}]   ;;  %s582_s6 = inlined_call_operand.<no memory space> [shape: f32[1,1], index: 6, kind: input, shape index: {}]   ;;  %s583_s7 = inlined_call_operand.hbm [shape: f32[1,8], index: 7, kind: output, shape index: {}]  }
   0x1   :  { %v12_v0 = vstv %s582_s6 }
   0x2   :  { %13 = vst [vmem:[#allocation2] sm:$0x1] %v12_v0 }
   0x3   :  { %14 = vsyncpa [#allocation4], 0 }
   0x4   :  { %15 = vsyncpa [#allocation7], 0 }
   0x5   :  { %16 = vsyncpa [#allocation5], 0  ;;  %s500_s26 = smov [#allocation6]  }
   0x6   :  { %s32_s27 = sshll.u32 %s500_s26, 4  ;;  %s33_s27 = int_to_ptr.vmem [resolvable:$true] %s32_s27 }
   0x7   :  { %s422_s28 = scalar_lea.vmem %s33_s27, 256  ;;  %p427_p1 = scmp.lt.s32.totalorder %s33_s27, %s33_s27 }
   0x8   :  { %p423_p0 = scmp.ne.s32.totalorder %s33_s27, %s422_s28  ;;  %p428_p2 = scmp.lt.s32.totalorder %s422_s28, %s422_s28 }
   0xa   :  { %p429_p3 = por %p428_p2, %p427_p1 }
   0xc   :  { %p430_p4 = pnand %p429_p3, %p423_p0 }
   0xe   :  { %433 = shalt.err (!%p430_p4)
}
   0xf   :  { %s501_s29 = smov 64   ;;  %s502_s30 = smov 4  }
  0x10   :  { %38 = dma.hbm_to_vmem [thread:$0]  %s577_s1, 256, %s33_s27, [#allocation7], %s501_s29, %s501_s29, %s502_s30  }
  0x11   :  { %s503_s6 = smov [#allocation3]   ;;  %s504_s11 = smov [#allocation8]  }
  0x12   :  { %s23_s10 = sshll.u32 %s503_s6, 4  ;;  %s46_s12 = sshll.u32 %s504_s11, 4  ;;  %s24_s10 = int_to_ptr.vmem [resolvable:$true] %s23_s10  ;;  %s47_s12 = int_to_ptr.vmem [resolvable:$true] %s46_s12 }
  0x13   :  { %s442_s13 = scalar_lea.vmem %s24_s10, 128  ;;  %p447_p6 = scmp.lt.s32.totalorder %s24_s10, %s24_s10 }
  0x14   :  { %p443_p5 = scmp.ne.s32.totalorder %s24_s10, %s442_s13  ;;  %p448_p7 = scmp.lt.s32.totalorder %s442_s13, %s442_s13 }
  0x16   :  { %p449_p8 = por %p448_p7, %p447_p6 }
  0x18   :  { %p450_p9 = pnand %p449_p8, %p443_p5 }
  0x1a   :  { %453 = shalt.err (!%p450_p9)
}
  0x1b   :  { %26 = dma.hbm_to_vmem [thread:$0]  %s576_s0, 128, %s24_s10, [#allocation4]  }
  0x1c   :  { %s462_s16 = scalar_lea.vmem %s47_s12, 1024  ;;  %p467_p11 = scmp.lt.s32.totalorder %s47_s12, %s47_s12 }
  0x1d   :  { %p463_p10 = scmp.ne.s32.totalorder %s47_s12, %s462_s16  ;;  %p468_p12 = scmp.lt.s32.totalorder %s462_s16, %s462_s16 }
  0x1f   :  { %p469_p13 = por %p468_p12, %p467_p11 }
  0x21   :  { %p470_p0 = pnand %p469_p13, %p463_p10 }
  0x23   :  { %473 = shalt.err (!%p470_p0)
}
  0x24   :  { %52 = dma.hbm_to_vmem [thread:$0]  %s579_s3, 1024, %s47_s12, [#allocation7], %s501_s29, %s501_s29, %s502_s30  }
  0x25   :  { %494 = dma.done.wait [#allocation4], 128  }
  0x26   :  { %495 = vsyncadd [#allocation4], 4294967168 }
  0x27   :  { %496 = dma.done.wait [#allocation7], 1280  }
  0x28   :  { %497 = vsyncadd [#allocation7], 4294966016  ;;  %v505_v1 = vmov 0.0   ;;  %vm506_vm0 = vmmov 0   ;;  %v400_v2 = vld [vmem:[#allocation6 + $0x8] sm:$0xff]   ;;  %v401_v3 = vld [vmem:[#allocation6] sm:$0xff]   ;;  %v260_v33 = vlaneseq }
  0x29   :  { %356 = vmatprep.subr.bf16.mxu0 %v505_v1  ;;  %360 = vmatprep.mubr.msk.bf16.mxu0 %vm506_vm0, %v505_v1  ;;  %v69_v4 = vld [vmem:[#allocation3] sm:$0xff]  ;;  %v402_v5 = vld [vmem:[#allocation8 + $0x38] sm:$0xff]   ;;  %v403_v7 = vld [vmem:[#allocation8 + $0x30] sm:$0xff]   ;;  %vm94_vm1 = vcmask 261120   ;;  %v507_v23 = vmov 0   ;;  %vm310_vm2 = vcmask 57344  }
  0x2a   :  { %364 = vmatprep.subr.bf16.mxu1 %v505_v1  ;;  %380 = vmatprep.mubr.msk.bf16.mxu1 %vm506_vm0, %v505_v1  ;;  %v70_v6 = vpack.c.bf16 %v69_v4, %v69_v4  ;;  %v404_v8 = vld [vmem:[#allocation8 + $0x28] sm:$0xff]   ;;  %v405_v9 = vld [vmem:[#allocation8 + $0x20] sm:$0xff]   ;;  %v406_v10 = vld [vmem:[#allocation8 + $0x18] sm:$0xff]   ;;  %v261_v34 = vshrl.u32 %v260_v33, 7 }
  0x2b   :  { %357 = vmatpush3.bf16.msra.mxu0 %v400_v2  ;;  %365 = vmatpush3.bf16.msra.mxu1 %v402_v5  ;;  %v407_v11 = vld [vmem:[#allocation8 + $0x10] sm:$0xff]   ;;  %v408_v12 = vld [vmem:[#allocation8 + $0x8] sm:$0xff]   ;;  %v409_v13 = vld [vmem:[#allocation8] sm:$0xff]  }
  0x2c   :  { %358 = vmatprep.subr.bf16.mxu0 %v505_v1  ;;  %366 = vmatprep.subr.bf16.mxu1 %v505_v1  ;;  %v328_v14 = vld [vmem:[%s578_s2] ss:$0 sm:$0xff]  ;;  %v262_v35 = vsub.s32 0, %v261_v34 }
  0x2d   :  { %v254_v22 = vld [vmem:[#allocation2] sm:$0x1]  ;;  %399 = vset.pattern.permute.xlu0 %v507_v23 }
  0x2e   :  { %257 = vperm.xlu0 %399, %v254_v22   ;;  %v332_v24 = vld [vmem:[%s580_s4] ss:$0 sm:$0xff]  ;;  %s508_s4 = smov [#allocation9]  }
  0x2f   :  { %359 = vmatpush3.bf16.msra.mxu0 %v401_v3  ;;  %367 = vmatpush3.bf16.msra.mxu1 %v403_v7  ;;  %v253_v32 = vld [vmem:[%s581_s5] sm:$0x1]  ;;  %s318_s21 = sshll.u32 %s508_s4, 4  ;;  %s319_s21 = int_to_ptr.vmem [resolvable:$true] %s318_s21 }
  0x30   :  { %384 = vmatprep.subr.bf16.mxu0 %v505_v1  ;;  %368 = vmatprep.subr.bf16.mxu1 %v505_v1  ;;  %s474_s5 = scalar_lea.vmem %s319_s21, 16  ;;  %s478_s22 = scalar_lea.vmem %s319_s21, 32 }
  0x31   :  { %p475_p1 = scmp.ne.s32.totalorder %s319_s21, %s474_s5  ;;  %p479_p2 = scmp.lt.s32.totalorder %s319_s21, %s319_s21 }
  0x32   :  { %361 = vmatmul.mubr.msk.bf16.vlgmr.msra.gmra.mxu0 %vm94_vm1, %v70_v6  ;;  %p480_p3 = scmp.lt.s32.totalorder %s478_s22, %s474_s5 }
  0x33   :  { %386 = vmatprep.mubr.msk.bf16.mxu0 %vm506_vm0, %v505_v1  ;;  %369 = vmatpush3.bf16.msra.mxu1 %v404_v8 }
  0x34   :  { %370 = vmatprep.subr.bf16.mxu1 %v505_v1  ;;  %p481_p4 = por %p480_p3, %p479_p2 }
  0x36   :  { %p482_p5 = pnand %p481_p4, %p475_p1 }
  0x37   :  { %371 = vmatpush3.bf16.msra.mxu1 %v405_v9 }
  0x38   :  { %372 = vmatprep.subr.bf16.mxu1 %v505_v1 }
  0x3b   :  { %373 = vmatpush3.bf16.msra.mxu1 %v406_v10 }
  0x3c   :  { %374 = vmatprep.subr.bf16.mxu1 %v505_v1 }
  0x3f   :  { %375 = vmatpush3.bf16.msra.mxu1 %v407_v11 }
  0x40   :  { %376 = vmatprep.subr.bf16.mxu1 %v505_v1 }
  0x43   :  { %377 = vmatpush3.bf16.msra.mxu1 %v408_v12 }
  0x44   :  { %378 = vmatprep.subr.bf16.mxu1 %v505_v1 }
  0x47   :  { %379 = vmatpush3.bf16.msra.mxu1 %v409_v13 }
  0xa9   :  { %v258_v36 = vpop.permute.xlu0 %257 }
  0xaa   :  { %v263_v37 = vrot.slane %v258_v36, %v262_v35 }
  0xf2   :  { %v132_v15 = vpop.f32.mrf.mxu0 }
  0xf3   :  { %v133_v16 = vadd.f32 %v328_v14, %v132_v15 }
  0xf4   :  { %v362_v17 = vpop.f32.mrf.mxu0 }
  0xf5   :  { %v138_v18 = vmax.f32 %v133_v16, 0.0 }
  0xf6   :  { %v135_v19 = vpop.f32.mrf.mxu0 }
  0xf7   :  { %v139_v20 = vpack.c.bf16 %v138_v18, %v138_v18 }
  0xf8   :  { %v363_v21 = vpop.f32.mrf.mxu0 }
  0xf9   :  { %381 = vmatmul.mubr.bf16.vlgmr.msra.gmra.mxu1 %v139_v20 }
 0x1b9   :  { %v245_v25 = vpop.f32.mrf.mxu1 }
 0x1ba   :  { %v246_v26 = vadd.f32 %v332_v24, %v245_v25 }
 0x1bb   :  { %v382_v27 = vpop.f32.mrf.mxu1 }
 0x1bc   :  { %v251_v28 = vmax.f32 %v246_v26, 0.0 }
 0x1bd   :  { %v248_v29 = vpop.f32.mrf.mxu1 }
 0x1be   :  { %v252_v30 = vpack.c.bf16 %v251_v28, %v251_v28 }
 0x1bf   :  { %v383_v31 = vpop.f32.mrf.mxu1 }
 0x1c0   :  { %385 = vmatpush3.bf16.xpose.msra.mxu0 %v252_v30 }
 0x1c7   :  { %387 = vmatmul.mubr.bf16.vlgmr.msra.gmra.mxu0 %v253_v32 }
 0x287   :  { %v298_v38 = vpop.f32.mrf.mxu0 }
 0x288   :  { %v299_v39 = vadd.f32 %v298_v38, %v263_v37 }
 0x289   :  { %v388_v40 = vpop.f32.mrf.mxu0 }
 0x28a   :  { %v341_v41 = vmul.f32 -1.442695, %v299_v39 }
 0x28b   :  { %v301_v42 = vpop.f32.mrf.mxu0 }
 0x28c   :  { %410 = vpow2.f32 %v341_v41 }
 0x28d   :  { %v389_v43 = vpop.f32.mrf.mxu0 }
 0x299   :  { %v411_v44 = vpop.eup %410 }
 0x29a   :  { %v307_v45 = vadd.f32 1.0, %v411_v44 }
 0x29c   :  { %412 = vrcp.f32 %v307_v45 }
 0x2a9   :  { %v413_v46 = vpop.eup %412 }
 0x2aa   :  { %311 = vst.msk [vmem:[#allocation9] sm:$0x1] %vm310_vm2, %v413_v46 }
 0x2ab   :  { %485 = shalt.err (!%p482_p5)
}
 0x2ac   :  { %321 = dma.vmem_to_hbm [thread:$0]  %s319_s21, 16, %s583_s7, [#allocation5]  }
 0x2ad   :  { %498 = dma.done.wait [#allocation5], 16  }
 0x2ae   :  { %499 = vsyncadd [#allocation5], 4294967280 }
 0x2af   :  { %325 = vsyncpa [#allocation4], 1 }
 0x2b0   :  { %326 = vsyncpa [#allocation7], 1 }
 0x2b1   :  { %327 = vsyncpa [#allocation5], 1 }

// kernel: ffn_classifier_forward.1
= control target key start
LH: loop header
LB: loop body
LE: loop exit
PB: predicated region body
PF: predicated region fallthrough
CT: control target
= control target key end

     0   :  { %s576_s0 = inlined_call_operand.hbm [shape: f32[8,32], index: 0, kind: input, shape index: {}]   ;;  %s577_s1 = inlined_call_operand.hbm [shape: bf16[32,128], index: 1, kind: input, shape index: {}]   ;;  %s578_s2 = inlined_call_operand.vmem [shape: f32[1,128], index: 2, kind: input, shape index: {}]   ;;  %s579_s3 = inlined_call_operand.hbm [shape: bf16[128,128], index: 3, kind: input, shape index: {}]   ;;  %s580_s4 = inlined_call_operand.vmem [shape: f32[1,128], index: 4, kind: input, shape index: {}]   ;;  %s581_s5 = inlined_call_operand.vmem [shape: bf16[1,128], index: 5, kind: input, shape index: {}]   ;;  %s582_s6 = inlined_call_operand.<no memory space> [shape: f32[1,1], index: 6, kind: input, shape index: {}]   ;;  %s583_s7 = inlined_call_operand.hbm [shape: f32[1,8], index: 7, kind: output, shape index: {}]  }
   0x1   :  { %v12_v0 = vstv %s582_s6 }
   0x2   :  { %13 = vst [vmem:[#allocation2] sm:$0x1] %v12_v0 }
   0x3   :  { %14 = vsyncpa [#allocation4], 0 }
   0x4   :  { %15 = vsyncpa [#allocation7], 0 }
   0x5   :  { %16 = vsyncpa [#allocation5], 0  ;;  %s500_s26 = smov [#allocation6]  }
   0x6   :  { %s32_s27 = sshll.u32 %s500_s26, 4  ;;  %s33_s27 = int_to_ptr.vmem [resolvable:$true] %s32_s27 }
   0x7   :  { %s422_s28 = scalar_lea.vmem %s33_s27, 256  ;;  %p427_p1 = scmp.lt.s32.totalorder %s33_s27, %s33_s27 }
   0x8   :  { %p423_p0 = scmp.ne.s32.totalorder %s33_s27, %s422_s28  ;;  %p428_p2 = scmp.lt.s32.totalorder %s422_s28, %s422_s28 }
   0xa   :  { %p429_p3 = por %p428_p2, %p427_p1 }
   0xc   :  { %p430_p4 = pnand %p429_p3, %p423_p0 }
   0xe   :  { %433 = shalt.err (!%p430_p4)
}
   0xf   :  { %s501_s29 = smov 64   ;;  %s502_s30 = smov 4  }
  0x10   :  { %38 = dma.hbm_to_vmem [thread:$0]  %s577_s1, 256, %s33_s27, [#allocation7], %s501_s29, %s501_s29, %s502_s30  }
  0x11   :  { %s503_s6 = smov [#allocation3]   ;;  %s504_s11 = smov [#allocation8]  }
  0x12   :  { %s23_s10 = sshll.u32 %s503_s6, 4  ;;  %s46_s12 = sshll.u32 %s504_s11, 4  ;;  %s24_s10 = int_to_ptr.vmem [resolvable:$true] %s23_s10  ;;  %s47_s12 = int_to_ptr.vmem [resolvable:$true] %s46_s12 }
  0x13   :  { %s442_s13 = scalar_lea.vmem %s24_s10, 128  ;;  %p447_p6 = scmp.lt.s32.totalorder %s24_s10, %s24_s10 }
  0x14   :  { %p443_p5 = scmp.ne.s32.totalorder %s24_s10, %s442_s13  ;;  %p448_p7 = scmp.lt.s32.totalorder %s442_s13, %s442_s13 }
  0x16   :  { %p449_p8 = por %p448_p7, %p447_p6 }
  0x18   :  { %p450_p9 = pnand %p449_p8, %p443_p5 }
  0x1a   :  { %453 = shalt.err (!%p450_p9)
}
  0x1b   :  { %26 = dma.hbm_to_vmem [thread:$0]  %s576_s0, 128, %s24_s10, [#allocation4]  }
  0x1c   :  { %s462_s16 = scalar_lea.vmem %s47_s12, 1024  ;;  %p467_p11 = scmp.lt.s32.totalorder %s47_s12, %s47_s12 }
  0x1d   :  { %p463_p10 = scmp.ne.s32.totalorder %s47_s12, %s462_s16  ;;  %p468_p12 = scmp.lt.s32.totalorder %s462_s16, %s462_s16 }
  0x1f   :  { %p469_p13 = por %p468_p12, %p467_p11 }
  0x21   :  { %p470_p0 = pnand %p469_p13, %p463_p10 }
  0x23   :  { %473 = shalt.err (!%p470_p0)
}
  0x24   :  { %52 = dma.hbm_to_vmem [thread:$0]  %s579_s3, 1024, %s47_s12, [#allocation7], %s501_s29, %s501_s29, %s502_s30  }
  0x25   :  { %494 = dma.done.wait [#allocation4], 128  }
  0x26   :  { %495 = vsyncadd [#allocation4], 4294967168 }
  0x27   :  { %496 = dma.done.wait [#allocation7], 1280  }
  0x28   :  { %497 = vsyncadd [#allocation7], 4294966016  ;;  %v505_v1 = vmov 0.0   ;;  %vm506_vm0 = vmmov 0   ;;  %v400_v2 = vld [vmem:[#allocation6 + $0x8] sm:$0xff]   ;;  %v401_v3 = vld [vmem:[#allocation6] sm:$0xff]   ;;  %v260_v33 = vlaneseq }
  0x29   :  { %356 = vmatprep.subr.bf16.mxu0 %v505_v1  ;;  %360 = vmatprep.mubr.msk.bf16.mxu0 %vm506_vm0, %v505_v1  ;;  %v69_v4 = vld [vmem:[#allocation3] sm:$0xff]  ;;  %v402_v5 = vld [vmem:[#allocation8 + $0x38] sm:$0xff]   ;;  %v403_v7 = vld [vmem:[#allocation8 + $0x30] sm:$0xff]   ;;  %vm94_vm1 = vcmask 261120   ;;  %v507_v23 = vmov 0   ;;  %vm310_vm2 = vcmask 57344  }
  0x2a   :  { %364 = vmatprep.subr.bf16.mxu1 %v505_v1  ;;  %380 = vmatprep.mubr.msk.bf16.mxu1 %vm506_vm0, %v505_v1  ;;  %v70_v6 = vpack.c.bf16 %v69_v4, %v69_v4  ;;  %v404_v8 = vld [vmem:[#allocation8 + $0x28] sm:$0xff]   ;;  %v405_v9 = vld [vmem:[#allocation8 + $0x20] sm:$0xff]   ;;  %v406_v10 = vld [vmem:[#allocation8 + $0x18] sm:$0xff]   ;;  %v261_v34 = vshrl.u32 %v260_v33, 7 }
  0x2b   :  { %357 = vmatpush3.bf16.msra.mxu0 %v400_v2  ;;  %365 = vmatpush3.bf16.msra.mxu1 %v402_v5  ;;  %v407_v11 = vld [vmem:[#allocation8 + $0x10] sm:$0xff]   ;;  %v408_v12 = vld [vmem:[#allocation8 + $0x8] sm:$0xff]   ;;  %v409_v13 = vld [vmem:[#allocation8] sm:$0xff]  }
  0x2c   :  { %358 = vmatprep.subr.bf16.mxu0 %v505_v1  ;;  %366 = vmatprep.subr.bf16.mxu1 %v505_v1  ;;  %v328_v14 = vld [vmem:[%s578_s2] ss:$0 sm:$0xff]  ;;  %v262_v35 = vsub.s32 0, %v261_v34 }
  0x2d   :  { %v254_v22 = vld [vmem:[#allocation2] sm:$0x1]  ;;  %399 = vset.pattern.permute.xlu0 %v507_v23 }
  0x2e   :  { %257 = vperm.xlu0 %399, %v254_v22   ;;  %v332_v24 = vld [vmem:[%s580_s4] ss:$0 sm:$0xff]  ;;  %s508_s4 = smov [#allocation9]  }
  0x2f   :  { %359 = vmatpush3.bf16.msra.mxu0 %v401_v3  ;;  %367 = vmatpush3.bf16.msra.mxu1 %v403_v7  ;;  %v253_v32 = vld [vmem:[%s581_s5] sm:$0x1]  ;;  %s318_s21 = sshll.u32 %s508_s4, 4  ;;  %s319_s21 = int_to_ptr.vmem [resolvable:$true] %s318_s21 }
  0x30   :  { %384 = vmatprep.subr.bf16.mxu0 %v505_v1  ;;  %368 = vmatprep.subr.bf16.mxu1 %v505_v1  ;;  %s474_s5 = scalar_lea.vmem %s319_s21, 16  ;;  %s478_s22 = scalar_lea.vmem %s319_s21, 32 }
  0x31   :  { %p475_p1 = scmp.ne.s32.totalorder %s319_s21, %s474_s5  ;;  %p479_p2 = scmp.lt.s32.totalorder %s319_s21, %s319_s21 }
  0x32   :  { %361 = vmatmul.mubr.msk.bf16.vlgmr.msra.gmra.mxu0 %vm94_vm1, %v70_v6  ;;  %p480_p3 = scmp.lt.s32.totalorder %s478_s22, %s474_s5 }
  0x33   :  { %386 = vmatprep.mubr.msk.bf16.mxu0 %vm506_vm0, %v505_v1  ;;  %369 = vmatpush3.bf16.msra.mxu1 %v404_v8 }
  0x34   :  { %370 = vmatprep.subr.bf16.mxu1 %v505_v1  ;;  %p481_p4 = por %p480_p3, %p479_p2 }
  0x36   :  { %p482_p5 = pnand %p481_p4, %p475_p1 }
  0x37   :  { %371 = vmatpush3.bf16.msra.mxu1 %v405_v9 }
  0x38   :  { %372 = vmatprep.subr.bf16.mxu1 %v505_v1 }
  0x3b   :  { %373 = vmatpush3.bf16.msra.mxu1 %v406_v10 }
  0x3c   :  { %374 = vmatprep.subr.bf16.mxu1 %v505_v1 }
  0x3f   :  { %375 = vmatpush3.bf16.msra.mxu1 %v407_v11 }
  0x40   :  { %376 = vmatprep.subr.bf16.mxu1 %v505_v1 }
  0x43   :  { %377 = vmatpush3.bf16.msra.mxu1 %v408_v12 }
  0x44   :  { %378 = vmatprep.subr.bf16.mxu1 %v505_v1 }
  0x47   :  { %379 = vmatpush3.bf16.msra.mxu1 %v409_v13 }
  0xa9   :  { %v258_v36 = vpop.permute.xlu0 %257 }
  0xaa   :  { %v263_v37 = vrot.slane %v258_v36, %v262_v35 }
  0xf2   :  { %v132_v15 = vpop.f32.mrf.mxu0 }
  0xf3   :  { %v133_v16 = vadd.f32 %v328_v14, %v132_v15 }
  0xf4   :  { %v362_v17 = vpop.f32.mrf.mxu0 }
  0xf5   :  { %v138_v18 = vmax.f32 %v133_v16, 0.0 }
  0xf6   :  { %v135_v19 = vpop.f32.mrf.mxu0 }
  0xf7   :  { %v139_v20 = vpack.c.bf16 %v138_v18, %v138_v18 }
  0xf8   :  { %v363_v21 = vpop.f32.mrf.mxu0 }
  0xf9   :  { %381 = vmatmul.mubr.bf16.vlgmr.msra.gmra.mxu1 %v139_v20 }
 0x1b9   :  { %v245_v25 = vpop.f32.mrf.mxu1 }
 0x1ba   :  { %v246_v26 = vadd.f32 %v332_v24, %v245_v25 }
 0x1bb   :  { %v382_v27 = vpop.f32.mrf.mxu1 }
 0x1bc   :  { %v251_v28 = vmax.f32 %v246_v26, 0.0 }
 0x1bd   :  { %v248_v29 = vpop.f32.mrf.mxu1 }
 0x1be   :  { %v252_v30 = vpack.c.bf16 %v251_v28, %v251_v28 }
 0x1bf   :  { %v383_v31 = vpop.f32.mrf.mxu1 }
 0x1c0   :  { %385 = vmatpush3.bf16.xpose.msra.mxu0 %v252_v30 }
 0x1c7   :  { %387 = vmatmul.mubr.bf16.vlgmr.msra.gmra.mxu0 %v253_v32 }
 0x287   :  { %v298_v38 = vpop.f32.mrf.mxu0 }
 0x288   :  { %v299_v39 = vadd.f32 %v298_v38, %v263_v37 }
 0x289   :  { %v388_v40 = vpop.f32.mrf.mxu0 }
 0x28a   :  { %v341_v41 = vmul.f32 -1.442695, %v299_v39 }
 0x28b   :  { %v301_v42 = vpop.f32.mrf.mxu0 }
 0x28c   :  { %410 = vpow2.f32 %v341_v41 }
 0x28d   :  { %v389_v43 = vpop.f32.mrf.mxu0 }
 0x299   :  { %v411_v44 = vpop.eup %410 }
 0x29a   :  { %v307_v45 = vadd.f32 1.0, %v411_v44 }
 0x29c   :  { %412 = vrcp.f32 %v307_v45 }
 0x2a9   :  { %v413_v46 = vpop.eup %412 }
 0x2aa   :  { %311 = vst.msk [vmem:[#allocation9] sm:$0x1] %vm310_vm2, %v413_v46 }
 0x2ab   :  { %485 = shalt.err (!%p482_p5)
}
 0x2ac   :  { %321 = dma.vmem_to_hbm [thread:$0]  %s319_s21, 16, %s583_s7, [#allocation5]  }
 0x2ad   :  { %498 = dma.done.wait [#allocation5], 16  }
 0x2ae   :  { %499 = vsyncadd [#allocation5], 4294967280 }
 0x2af   :  { %325 = vsyncpa [#allocation4], 1 }
 0x2b0   :  { %326 = vsyncpa [#allocation7], 1 }
 0x2b1   :  { %327 = vsyncpa [#allocation5], 1 }

</bundles_post_ra>
